<compile_context>
chip_gen: v6e
topology: v6e:2x2x1
jax: 0.10.0
libtpu: 0.0.40
codegen_flags: <defaults>
</compile_context>

<pallas_src>
import functools

import jax
import jax.numpy as jnp
from jax.experimental import pallas as pl
from jax.experimental.pallas import tpu as pltpu


def _gating_kernel(x_ref, w_ref, b_ref, o_ref):
    # x_ref: (C_in, tHW)   -- spatial on the lane axis
    # w_ref: (C_out, C_in) -- BN-folded conv weight (no transpose needed: W @ x)
    # b_ref: (C_out, 1)    -- BN-folded bias, broadcast over lanes
    # o_ref: (C_out, tHW)
    y = jnp.dot(w_ref[...], x_ref[...], preferred_element_type=jnp.float32)
    y = y + b_ref[...]
    o_ref[...] = jnp.maximum(y, 0.0).astype(o_ref.dtype)   # ReLU


def _pick_hw_tile(hw: int) -> int:
    # Lane-aligned streaming tile.  For small maps take the whole extent (full-dim
    # blocks are always legal); for large maps stream 512-wide lane-dense tiles
    # (ragged tail handled by Pallas masking -- safe since positions are independent).
    if hw <= 512:
        return hw
    return 512


@functools.partial(jax.jit, static_argnames=("eps",))
def unet_grid_gating_signal(x_nchw, conv_w, conv_b, bn_gamma, bn_beta,
                            bn_mean, bn_var, eps=1e-5):
    """x_nchw: (N, C_in, H, W) f32. conv_w: (C_out, C_in, 1, 1). Returns (N, C_out, H, W)."""
    N, C_in, H, W = x_nchw.shape
    C_out = conv_w.shape[0]
    HW = H * W

    # Fold inference-mode BatchNorm into the 1x1 conv (exact).
    w2d = conv_w.reshape(C_out, C_in).astype(jnp.float32)
    scale = bn_gamma / jnp.sqrt(bn_var + eps)                       # (C_out,)
    w_fold = w2d * scale[:, None]                                   # (C_out, C_in)
    b_fold = (scale * (conv_b - bn_mean) + bn_beta).reshape(C_out, 1)

    x_flat = x_nchw.reshape(N, C_in, HW)
    t_hw = _pick_hw_tile(HW)
    grid = (N, pl.cdiv(HW, t_hw))

    out = pl.pallas_call(
        _gating_kernel,
        out_shape=jax.ShapeDtypeStruct((N, C_out, HW), x_nchw.dtype),
        grid=grid,
        in_specs=[
            # x: one batch element, full channels, one lane-aligned spatial tile.
            pl.BlockSpec((pl.Squeezed(), C_in, t_hw), lambda n, h: (n, 0, h)),
            # folded weight / bias: tiny, resident for every grid step.
            pl.BlockSpec((C_out, C_in), lambda n, h: (0, 0)),
            pl.BlockSpec((C_out, 1), lambda n, h: (0, 0)),
        ],
        out_specs=pl.BlockSpec((pl.Squeezed(), C_out, t_hw), lambda n, h: (n, 0, h)),
        compiler_params=pltpu.CompilerParams(
            # Both grid axes produce independent output tiles -> megacore-shardable.
            dimension_semantics=("parallel", "parallel"),
            # Safe on every generation (default scoped VMEM is 16 MiB on v5e);
            # well under v7x's 64 MiB physical VMEM even double-buffered.
            vmem_limit_bytes=32 << 20,
        ),
    )(x_flat, w_fold, b_fold)

    return out.reshape(N, C_out, H, W)


def unet_grid_gating_signal_reference(x, conv_w, conv_b, gamma, beta, mean, var, eps=1e-5):
    C_out, C_in = conv_w.shape[0], conv_w.shape[1]
    y = jnp.einsum("oc,nchw->nohw", conv_w.reshape(C_out, C_in), x)
    y = y + conv_b[None, :, None, None]
    y = gamma[None, :, None, None] * (y - mean[None, :, None, None]) / \
        jnp.sqrt(var[None, :, None, None] + eps) + beta[None, :, None, None]
    return jnp.maximum(y, 0.0)


if __name__ == "__main__":
    N, C_in, C_out, H, W = 2, 4, 8, 16, 16

    key = jax.random.PRNGKey(0)
    kx, kw, kb, kg, kbe, km, kv = jax.random.split(key, 7)

    x = jax.random.normal(kx, (N, C_in, H, W), dtype=jnp.float32)
    # Conv2d(in_size, out_size, kernel_size=1) parameters.
    conv_w = jax.random.normal(kw, (C_out, C_in, 1, 1), dtype=jnp.float32) * 0.1
    conv_b = jax.random.normal(kb, (C_out,), dtype=jnp.float32) * 0.1
    # BatchNorm2d(out_size) parameters (inference / running-stats mode).
    bn_gamma = 1.0 + 0.1 * jax.random.normal(kg, (C_out,), dtype=jnp.float32)
    bn_beta = 0.1 * jax.random.normal(kbe, (C_out,), dtype=jnp.float32)
    bn_mean = 0.1 * jax.random.normal(km, (C_out,), dtype=jnp.float32)
    bn_var = jnp.abs(jax.random.normal(kv, (C_out,), dtype=jnp.float32)) + 0.5

    out = unet_grid_gating_signal(x, conv_w, conv_b, bn_gamma, bn_beta, bn_mean, bn_var)
    out = jax.block_until_ready(out)

    ref = unet_grid_gating_signal_reference(x, conv_w, conv_b, bn_gamma, bn_beta,
                                            bn_mean, bn_var)
    assert out.shape == (N, C_out, H, W), out.shape
    assert jnp.allclose(out, ref, atol=1e-4, rtol=1e-4), "mismatch vs reference"

    print("KERNEL_OK")
</pallas_src>

<mosaic_0001>
module attributes {stable_mosaic.version = 11 : i64} {
  func.func @_gating_kernel(%arg0: i32, %arg1: i32, %arg2: memref<1x4x256xf32, #tpu.memory_space<vmem>>, %arg3: memref<8x4xf32, #tpu.memory_space<vmem>>, %arg4: memref<8x1xf32, #tpu.memory_space<vmem>>, %arg5: memref<1x8x256xf32, #tpu.memory_space<vmem>>) attributes {dimension_semantics = [#tpu.dimension_semantics<parallel>, #tpu.dimension_semantics<parallel>], iteration_bounds = array<i64: 2, 1>, scalar_prefetch = 0 : i64, scratch_operands = 0 : i64, tpu.core_type = #tpu.core_type<tc>, window_params = [{transform_indices = @transform_0, window_bounds = array<i64: 1, 4, 256>}, {pipeline_mode = #tpu.pipeline_mode<synchronous>, transform_indices = @transform_1, window_bounds = array<i64: 8, 4>}, {pipeline_mode = #tpu.pipeline_mode<synchronous>, transform_indices = @transform_2, window_bounds = array<i64: 8, 1>}, {transform_indices = @transform_3, window_bounds = array<i64: 1, 8, 256>}]} {
    %c0 = arith.constant 0 : index
    %c0_0 = arith.constant 0 : index
    %0 = vector.load %arg3[%c0, %c0_0] : memref<8x4xf32, #tpu.memory_space<vmem>>, vector<8x4xf32>
    %c0_1 = arith.constant 0 : index
    %c0_2 = arith.constant 0 : index
    %c0_3 = arith.constant 0 : index
    %1 = vector.load %arg2[%c0_1, %c0_2, %c0_3] : memref<1x4x256xf32, #tpu.memory_space<vmem>>, vector<1x4x256xf32>
    %2 = vector.shape_cast %1 : vector<1x4x256xf32> to vector<4x256xf32>
    %cst = arith.constant dense<0.000000e+00> : vector<8x256xf32>
    %3 = tpu.matmul %0, %2, %cst {dimension_numbers = #tpu.dot_dimension_numbers<[1], [0], [0], [1], [0, 0, 1, 1], [], []>} : vector<8x4xf32>, vector<4x256xf32>, vector<8x256xf32> -> vector<8x256xf32>
    %c0_4 = arith.constant 0 : index
    %c0_5 = arith.constant 0 : index
    %4 = vector.load %arg4[%c0_4, %c0_5] : memref<8x1xf32, #tpu.memory_space<vmem>>, vector<8x1xf32>
    %5 = vector.broadcast %4 : vector<8x1xf32> to vector<8x256xf32>
    %6 = arith.addf %3, %5 : vector<8x256xf32>
    %cst_6 = arith.constant 0.000000e+00 : f32
    %7 = vector.broadcast %cst_6 : f32 to vector<8x256xf32>
    %8 = arith.maximumf %6, %7 : vector<8x256xf32>
    %c0_7 = arith.constant 0 : index
    %c0_8 = arith.constant 0 : index
    %c0_9 = arith.constant 0 : index
    %9 = vector.load %arg5[%c0_7, %c0_8, %c0_9] : memref<1x8x256xf32, #tpu.memory_space<vmem>>, vector<1x8x256xf32>
    %10 = vector.shape_cast %9 : vector<1x8x256xf32> to vector<8x256xf32>
    %11 = vector.shape_cast %8 : vector<8x256xf32> to vector<1x8x256xf32>
    tpu.vector_store %arg5[%c0_7, %c0_8, %c0_9], %11 {strides = array<i32>} : memref<1x8x256xf32, #tpu.memory_space<vmem>>, vector<1x8x256xf32>,
    return
  }
  func.func @transform_0(%arg0: i32, %arg1: i32) -> (i32, i32, i32) {
    %c0_i32 = arith.constant 0 : i32
    %c0_i32_0 = arith.constant 0 : i32
    return %arg0, %c0_i32, %arg1 : i32, i32, i32
  }
  func.func @transform_1(%arg0: i32, %arg1: i32) -> (i32, i32) {
    %c0_i32 = arith.constant 0 : i32
    %c0_i32_0 = arith.constant 0 : i32
    %c0_i32_1 = arith.constant 0 : i32
    return %c0_i32, %c0_i32_0 : i32, i32
  }
  func.func @transform_2(%arg0: i32, %arg1: i32) -> (i32, i32) {
    %c0_i32 = arith.constant 0 : i32
    %c0_i32_0 = arith.constant 0 : i32
    %c0_i32_1 = arith.constant 0 : i32
    return %c0_i32, %c0_i32_0 : i32, i32
  }
  func.func @transform_3(%arg0: i32, %arg1: i32) -> (i32, i32, i32) {
    %c0_i32 = arith.constant 0 : i32
    %c0_i32_0 = arith.constant 0 : i32
    return %arg0, %c0_i32, %arg1 : i32, i32, i32
  }
}

</mosaic_0001>

<bundles_post_ra>
// kernel: unet_grid_gating_signal.1
= control target key start
LH: loop header
LB: loop body
LE: loop exit
PB: predicated region body
PF: predicated region fallthrough
CT: control target
= control target key end

     0   :  { %s481_s12 = smov 0   ;;  %s483_s13 = smov 0   ;;  %s520_s0 = inlined_call_operand.vmem [shape: f32[2,4,256], index: 0, kind: input, shape index: {}]   ;;  %s521_s1 = inlined_call_operand.vmem [shape: f32[8,4], index: 1, kind: input, shape index: {}]   ;;  %s522_s2 = inlined_call_operand.vmem [shape: f32[8,1], index: 2, kind: input, shape index: {}]   ;;  %s523_s3 = inlined_call_operand.vmem [shape: f32[2,8,256], index: 3, kind: output, shape index: {}]  }
   0x1   :  { %s485_s14 = smov 0  }
   0x2 LB: > { %s25_s15 = sadd.s32 1, %s453_s13  ;;  %p395_p0 = scmp.ge.s32.totalorder %s457_s14, 1  ;;  %s457_s14 = sphi %s485_s14, %s13_s14   ;;  %s453_s13 = sphi %s483_s13, %s525_s13   ;;  %s449_s12 = sphi %s481_s12, %s524_s12  }
   0x3   : > { %p27_p1 = scmp.ge.s32.totalorder %s25_s15, 2  ;;  %p158_p2 = scmp.lt.s32.totalorder %s457_s14, 3 }
   0x5   : > { %s527_s15 = smov (%p27_p1, %s25_s15), 0  ;;  %p159_p3 = pnand %p395_p0, %p158_p2 }
   0x6   : > { %p191_p4 = scmp.lt.s32.totalorder (!%p159_p3), %s449_s12, 1 }
   0x7   : > { %162 = sbr.rel (%p159_p3) target bundleno = 220 (0xdc), region = 32 }
   0xc   : > { %v459_v0 = vmov 0.0   ;;  %v460_v1 = vmov 0   ;;  %v212_v2 = vld [vmem:[%s522_s2] sm:$0xff]  ;;  %s529_s12 = smov (!%p191_p4, %s449_s12), 1  ;;  %vm224_vm0 = vcmask 1043456   ;;  %vm220_vm1 = vcmask 31744  }
   0xd   : > { %293 = vmatprep.mubr.f32.mxu0 %v459_v0  ;;  %433 = vset.pattern.permute.xlu0 %v460_v1  ;;  %s405_s18 = sshll.u32 %s529_s12, 3  ;;  %v210_v5 = vld [vmem:[%s521_s1] sm:$0xff]  ;;  %s406_s24 = sshll.u32 %s529_s12, 4 }
   0xe   : > { %215 = vperm.xlu0 %433, %v212_v2   ;;  %s198_s21 = scalar_lea.vmem %s520_s0, %s405_s18  ;;  %s208_s27 = scalar_lea.vmem %s523_s3, %s406_s24 }
   0xf   : > { %v211_v3 = vld [vmem:[%s198_s21] sm:$0xff] }
  0x10   : > { %v219_v4 = vcombine.high %v211_v3, %v211_v3 }
  0x12   : > { %400 = vmatprep.subr.msk.mxu0 %vm224_vm0, %v219_v4 }
  0x13   : > { %401 = vmatpush1.msk.msra.mxu0 %vm224_vm0, %v211_v3 }
  0x14   : > { %402 = vmatmul.mubr.msk.f32.vlgmr.msra.gmra.mxu0 %vm220_vm1, %v210_v5 }
  0x89   : > { %v216_v6 = vpop.permute.xlu0 %215 }
  0xd4   : > { %v295_v7 = vpop.f32.mrf.mxu0 }
  0xd5   : > { %v296_v8 = vadd.f32 %v295_v7, %v216_v6 }
  0xd6   : > { %v297_v9 = vpop.f32.mrf.mxu0 }
  0xd7   : > { %v300_v10 = vmax.f32 %v296_v8, 0.0  ;;  %v298_v11 = vadd.f32 %v297_v9, %v216_v6 }
  0xd9   : > { %302 = vst [vmem:[%s208_s27] sm:$0xff] %v300_v10  ;;  %v301_v12 = vmax.f32 %v298_v11, 0.0 }
  0xdb   : > { %303 = vst [vmem:[%s208_s27 + $0x8] sm:$0xff] %v301_v12 }
  0xdc PF: > { %s13_s14 = sadd.s32 1, %s457_s14   ;;  %s524_s12 = smov %s453_s13 }
  0xdd   : > { %p10_p5 = scmp.ge.s32.totalorder %s13_s14, 4   ;;  %s525_s13 = smov %s527_s15 }
  0xdf   :  { %12 = sbr.rel (!%p10_p5) target bundleno = 2 (0x2), region = 62 }

</bundles_post_ra>
